<compile_context>
chip_gen: v6e
topology: v6e:2x2x1
jax: 0.10.0
libtpu: 0.0.40
codegen_flags: <defaults>
</compile_context>

<pallas_src>
import functools
import math

import jax
import jax.numpy as jnp
from jax.experimental import pallas as pl
from jax.experimental.pallas import tpu as pltpu


def _gat_layer_body(x, mask, wf, wa2, scale, shift, alpha):
    """One GAT layer on VMEM-resident values (no HBM traffic in here)."""
    f_out = wf.shape[1] - 1                                        # wf = [W | W@a1]
    # Single fused MXU pass: columns [0:f_out] give h = x@W, column f_out is f1.
    z = jnp.dot(x, wf, preferred_element_type=jnp.float32)         # (N, f_out+1)
    h = z[:, :f_out]                                               # (N, f_out)
    f1 = z[:, f_out:f_out + 1]                                     # (N, 1)
    # f2[j] = a2 . h[j] = x[j] . (W @ a2); contracted directly in row orientation.
    f2 = jax.lax.dot_general(wa2, x, (((1,), (1,)), ((), ())),
                             preferred_element_type=jnp.float32)   # (1, N)
    e = f1 + f2                                                    # (N, N)
    e = jnp.where(e > 0, e, alpha * e)                             # LeakyReLU

    # adjacency mask + row softmax (dim=1)
    att = jnp.where(mask, e, -1.0e12)
    att = att - jnp.max(att, axis=1, keepdims=True)
    p = jnp.exp(att)
    att = p * pl.reciprocal(jnp.sum(p, axis=1, keepdims=True), approx=True)

    # h' = att @ h ; BatchNorm1d (inference affine) ; ELU
    hp = jnp.dot(att, h, preferred_element_type=jnp.float32)       # (N, f_out)
    hp = hp * scale + shift
    # ELU; exp argument clamped to <= 0 so the discarded branch never evaluates
    # exp of large positives.  (exp(min(x,0)) - 1 used instead of expm1 since
    # expm1 lowering is not guaranteed across Mosaic versions.)
    return jnp.where(hp > 0, hp, jnp.exp(jnp.minimum(hp, 0.0)) - 1.0)


def make_fused_gat_kernel(num_layers, alpha):
    def kernel(*refs):
        adj_ref, x_ref = refs[0], refs[1]
        out_ref = refs[-1]
        mask = adj_ref[...] > 0.0      # adjacency compare done once, reused by all layers
        x = x_ref[...]
        for l in range(num_layers):
            wf_ref, wa2_ref, sc_ref, sh_ref = refs[2 + 4 * l: 2 + 4 * (l + 1)]
            x = _gat_layer_body(x, mask, wf_ref[...], wa2_ref[...],
                                sc_ref[...], sh_ref[...], alpha)
        out_ref[...] = x               # lane-dense (N, 128k) store
    return kernel


def _round_up(v, m):
    return ((v + m - 1) // m) * m


def _prep_layer(layer_params, pad_to=None):
    """Fold BN (eval) into an affine and fuse W / W@a1 / W@a2 for the kernel."""
    W, a, gamma, beta, run_mean, run_var = layer_params
    f_in, f_out = W.shape
    eps = 1e-5

    a1 = a[:f_out, :]                                  # (f_out, 1)
    a2 = a[f_out:, :]                                  # (f_out, 1)
    wa1 = jnp.dot(W, a1)                               # (f_in, 1)
    wa2 = jnp.dot(W, a2).reshape(1, f_in)              # (1, f_in)

    inv_std = 1.0 / jnp.sqrt(run_var + eps)
    scale = (gamma * inv_std).reshape(1, f_out)
    shift = (beta - run_mean * gamma * inv_std).reshape(1, f_out)

    if pad_to is not None and pad_to > f_out:          # lane-dense final output
        pad = pad_to - f_out
        W = jnp.pad(W, ((0, 0), (0, pad)))
        scale = jnp.pad(scale, ((0, 0), (0, pad)))
        shift = jnp.pad(shift, ((0, 0), (0, pad)))

    wf = jnp.concatenate([W, wa1], axis=1)             # (f_in, f_out[_pad] + 1)
    return wf, wa2, scale, shift


def gat_forward(x, adj, params, alpha=0.2):
    """GAT.forward (eval mode), all layers fused into a single pallas_call."""
    in_p, stack_ps, out_p = params
    layer_params = [in_p] + list(stack_ps) + [out_p]
    n = x.shape[0]
    out_f = out_p[0].shape[1]
    out_pad = _round_up(out_f, 128)

    flat_inputs = [adj, x]
    for i, p in enumerate(layer_params):
        pad_to = out_pad if i == len(layer_params) - 1 else None
        flat_inputs.extend(_prep_layer(p, pad_to=pad_to))

    vmem = pl.BlockSpec(memory_space=pltpu.MemorySpace.VMEM)
    kernel = make_fused_gat_kernel(num_layers=len(layer_params), alpha=alpha)
    out_padded = pl.pallas_call(
        kernel,
        out_shape=jax.ShapeDtypeStruct((n, out_pad), jnp.float32),
        in_specs=[vmem] * len(flat_inputs),
        out_specs=vmem,
    )(*flat_inputs)
    return out_padded[:, :out_f]


def init_gat_layer_params(key, f_in, f_out):
    """Deterministic xavier_normal_(gain=1.414)-style init + default BN stats."""
    kw, ka = jax.random.split(key)
    gain = 1.414
    std_w = gain * math.sqrt(2.0 / (f_in + f_out))
    W = std_w * jax.random.normal(kw, (f_in, f_out), jnp.float32)
    std_a = gain * math.sqrt(2.0 / (2 * f_out + 1))
    a = std_a * jax.random.normal(ka, (2 * f_out, 1), jnp.float32)
    gamma = jnp.ones((f_out,), jnp.float32)
    beta = jnp.zeros((f_out,), jnp.float32)
    run_mean = jnp.zeros((f_out,), jnp.float32)
    run_var = jnp.ones((f_out,), jnp.float32)
    return (W, a, gamma, beta, run_mean, run_var)


def init_gat_params(key, in_features, hid_features, out_features, layer_num=2):
    keys = jax.random.split(key, layer_num + 1)
    in_p = init_gat_layer_params(keys[0], in_features, hid_features)
    stack_ps = [init_gat_layer_params(keys[1 + i], hid_features, hid_features)
                for i in range(layer_num - 1)]
    out_p = init_gat_layer_params(keys[layer_num], hid_features, out_features)
    return in_p, stack_ps, out_p


if __name__ == "__main__":
    N = 8             # number of graph nodes
    IN_F = 16         # in_features
    HID_F = 32        # hid_features
    OUT_F = 8         # out_features
    LAYER_NUM = 2
    ALPHA = 0.2

    key = jax.random.PRNGKey(0)
    kx, kadj, kparams = jax.random.split(key, 3)

    x = jax.random.normal(kx, (N, IN_F), jnp.float32)
    adj = (jax.random.uniform(kadj, (N, N)) > 0.5).astype(jnp.float32)
    adj = jnp.maximum(adj, jnp.eye(N, dtype=jnp.float32))   # self loops

    params = init_gat_params(kparams, IN_F, HID_F, OUT_F, layer_num=LAYER_NUM)

    fwd = jax.jit(functools.partial(gat_forward, alpha=ALPHA))
    out = jax.block_until_ready(fwd(x, adj, params))
    assert out.shape == (N, OUT_F) and out.dtype == jnp.float32
    assert bool(jnp.all(jnp.isfinite(out)))
    print("KERNEL_OK")
</pallas_src>

<mosaic_0001>
module attributes {stable_mosaic.version = 11 : i64} {
  func.func @kernel(%arg0: memref<8x8xf32, #tpu.memory_space<vmem>>, %arg1: memref<8x16xf32, #tpu.memory_space<vmem>>, %arg2: memref<16x33xf32, #tpu.memory_space<vmem>>, %arg3: memref<1x16xf32, #tpu.memory_space<vmem>>, %arg4: memref<1x32xf32, #tpu.memory_space<vmem>>, %arg5: memref<1x32xf32, #tpu.memory_space<vmem>>, %arg6: memref<32x33xf32, #tpu.memory_space<vmem>>, %arg7: memref<1x32xf32, #tpu.memory_space<vmem>>, %arg8: memref<1x32xf32, #tpu.memory_space<vmem>>, %arg9: memref<1x32xf32, #tpu.memory_space<vmem>>, %arg10: memref<32x129xf32, #tpu.memory_space<vmem>>, %arg11: memref<1x32xf32, #tpu.memory_space<vmem>>, %arg12: memref<1x128xf32, #tpu.memory_space<vmem>>, %arg13: memref<1x128xf32, #tpu.memory_space<vmem>>, %arg14: memref<8x128xf32, #tpu.memory_space<vmem>>) attributes {dimension_semantics = [], scalar_prefetch = 0 : i64, scratch_operands = 0 : i64, tpu.core_type = #tpu.core_type<tc>} {
    %c0 = arith.constant 0 : index
    %c0_0 = arith.constant 0 : index
    %0 = vector.load %arg0[%c0, %c0_0] : memref<8x8xf32, #tpu.memory_space<vmem>>, vector<8x8xf32>
    %cst = arith.constant 0.000000e+00 : f32
    %1 = vector.broadcast %cst : f32 to vector<8x8xf32>
    %2 = arith.cmpf ogt, %0, %1 : vector<8x8xf32>
    %c0_1 = arith.constant 0 : index
    %c0_2 = arith.constant 0 : index
    %3 = vector.load %arg1[%c0_1, %c0_2] : memref<8x16xf32, #tpu.memory_space<vmem>>, vector<8x16xf32>
    %c0_3 = arith.constant 0 : index
    %c0_4 = arith.constant 0 : index
    %4 = vector.load %arg2[%c0_3, %c0_4] : memref<16x33xf32, #tpu.memory_space<vmem>>, vector<16x33xf32>
    %c0_5 = arith.constant 0 : index
    %c0_6 = arith.constant 0 : index
    %5 = vector.load %arg3[%c0_5, %c0_6] : memref<1x16xf32, #tpu.memory_space<vmem>>, vector<1x16xf32>
    %c0_7 = arith.constant 0 : index
    %c0_8 = arith.constant 0 : index
    %6 = vector.load %arg4[%c0_7, %c0_8] : memref<1x32xf32, #tpu.memory_space<vmem>>, vector<1x32xf32>
    %c0_9 = arith.constant 0 : index
    %c0_10 = arith.constant 0 : index
    %7 = vector.load %arg5[%c0_9, %c0_10] : memref<1x32xf32, #tpu.memory_space<vmem>>, vector<1x32xf32>
    %cst_11 = arith.constant dense<0.000000e+00> : vector<8x33xf32>
    %8 = tpu.matmul %3, %4, %cst_11 {dimension_numbers = #tpu.dot_dimension_numbers<[1], [0], [0], [1], [0, 0, 1, 1], [], []>} : vector<8x16xf32>, vector<16x33xf32>, vector<8x33xf32> -> vector<8x33xf32>
    %9 = vector.extract_strided_slice %8 {offsets = [0, 0], sizes = [8, 32], strides = [1, 1]} : vector<8x33xf32> to vector<8x32xf32>
    %10 = vector.extract_strided_slice %8 {offsets = [0, 32], sizes = [8, 1], strides = [1, 1]} : vector<8x33xf32> to vector<8x1xf32>
    %cst_12 = arith.constant dense<0.000000e+00> : vector<1x8xf32>
    %11 = tpu.matmul %5, %3, %cst_12 {dimension_numbers = #tpu.dot_dimension_numbers<[1], [1], [0], [0], [0, 0, 1, 0], [], []>} : vector<1x16xf32>, vector<8x16xf32>, vector<1x8xf32> -> vector<1x8xf32>
    %12 = vector.broadcast %10 : vector<8x1xf32> to vector<8x8xf32>
    %13 = vector.broadcast %11 : vector<1x8xf32> to vector<8x8xf32>
    %14 = arith.addf %12, %13 : vector<8x8xf32>
    %cst_13 = arith.constant 0.000000e+00 : f32
    %15 = vector.broadcast %cst_13 : f32 to vector<8x8xf32>
    %16 = arith.cmpf ogt, %14, %15 : vector<8x8xf32>
    %cst_14 = arith.constant 2.000000e-01 : f32
    %17 = vector.broadcast %cst_14 : f32 to vector<8x8xf32>
    %18 = arith.mulf %17, %14 : vector<8x8xf32>
    %19 = arith.select %16, %14, %18 : vector<8x8xi1>, vector<8x8xf32>
    %cst_15 = arith.constant -9.99999995E+11 : f32
    %20 = vector.broadcast %cst_15 : f32 to vector<8x8xf32>
    %21 = arith.select %2, %19, %20 : vector<8x8xi1>, vector<8x8xf32>
    %cst_16 = arith.constant dense<0xFF800000> : vector<8xf32>
    %22 = vector.multi_reduction <maximumf>, %21, %cst_16 [1] : vector<8x8xf32> to vector<8xf32>
    %23 = vector.shape_cast %22 : vector<8xf32> to vector<8x1xf32>
    %24 = vector.broadcast %23 : vector<8x1xf32> to vector<8x8xf32>
    %25 = arith.subf %21, %24 : vector<8x8xf32>
    %26 = math.exp %25 : vector<8x8xf32>
    %cst_17 = arith.constant dense<0.000000e+00> : vector<8xf32>
    %27 = vector.multi_reduction <add>, %26, %cst_17 [1] : vector<8x8xf32> to vector<8xf32>
    %28 = vector.shape_cast %27 : vector<8xf32> to vector<8x1xf32>
    %29 = tpu.reciprocal %28 {approx = true} : vector<8x1xf32> -> vector<8x1xf32>
    %30 = vector.broadcast %29 : vector<8x1xf32> to vector<8x8xf32>
    %31 = arith.mulf %26, %30 : vector<8x8xf32>
    %cst_18 = arith.constant dense<0.000000e+00> : vector<8x32xf32>
    %32 = tpu.matmul %31, %9, %cst_18 {dimension_numbers = #tpu.dot_dimension_numbers<[1], [0], [0], [1], [0, 0, 1, 1], [], []>} : vector<8x8xf32>, vector<8x32xf32>, vector<8x32xf32> -> vector<8x32xf32>
    %33 = vector.broadcast %6 : vector<1x32xf32> to vector<8x32xf32>
    %34 = arith.mulf %32, %33 : vector<8x32xf32>
    %35 = vector.broadcast %7 : vector<1x32xf32> to vector<8x32xf32>
    %36 = arith.addf %34, %35 : vector<8x32xf32>
    %cst_19 = arith.constant 0.000000e+00 : f32
    %37 = vector.broadcast %cst_19 : f32 to vector<8x32xf32>
    %38 = arith.cmpf ogt, %36, %37 : vector<8x32xf32>
    %cst_20 = arith.constant 0.000000e+00 : f32
    %39 = vector.broadcast %cst_20 : f32 to vector<8x32xf32>
    %40 = arith.minimumf %36, %39 : vector<8x32xf32>
    %41 = math.exp %40 : vector<8x32xf32>
    %cst_21 = arith.constant 1.000000e+00 : f32
    %42 = vector.broadcast %cst_21 : f32 to vector<8x32xf32>
    %43 = arith.subf %41, %42 : vector<8x32xf32>
    %44 = arith.select %38, %36, %43 : vector<8x32xi1>, vector<8x32xf32>
    %c0_22 = arith.constant 0 : index
    %c0_23 = arith.constant 0 : index
    %45 = vector.load %arg6[%c0_22, %c0_23] : memref<32x33xf32, #tpu.memory_space<vmem>>, vector<32x33xf32>
    %c0_24 = arith.constant 0 : index
    %c0_25 = arith.constant 0 : index
    %46 = vector.load %arg7[%c0_24, %c0_25] : memref<1x32xf32, #tpu.memory_space<vmem>>, vector<1x32xf32>
    %c0_26 = arith.constant 0 : index
    %c0_27 = arith.constant 0 : index
    %47 = vector.load %arg8[%c0_26, %c0_27] : memref<1x32xf32, #tpu.memory_space<vmem>>, vector<1x32xf32>
    %c0_28 = arith.constant 0 : index
    %c0_29 = arith.constant 0 : index
    %48 = vector.load %arg9[%c0_28, %c0_29] : memref<1x32xf32, #tpu.memory_space<vmem>>, vector<1x32xf32>
    %cst_30 = arith.constant dense<0.000000e+00> : vector<8x33xf32>
    %49 = tpu.matmul %44, %45, %cst_30 {dimension_numbers = #tpu.dot_dimension_numbers<[1], [0], [0], [1], [0, 0, 1, 1], [], []>} : vector<8x32xf32>, vector<32x33xf32>, vector<8x33xf32> -> vector<8x33xf32>
    %50 = vector.extract_strided_slice %49 {offsets = [0, 0], sizes = [8, 32], strides = [1, 1]} : vector<8x33xf32> to vector<8x32xf32>
    %51 = vector.extract_strided_slice %49 {offsets = [0, 32], sizes = [8, 1], strides = [1, 1]} : vector<8x33xf32> to vector<8x1xf32>
    %cst_31 = arith.constant dense<0.000000e+00> : vector<1x8xf32>
    %52 = tpu.matmul %46, %44, %cst_31 {dimension_numbers = #tpu.dot_dimension_numbers<[1], [1], [0], [0], [0, 0, 1, 0], [], []>} : vector<1x32xf32>, vector<8x32xf32>, vector<1x8xf32> -> vector<1x8xf32>
    %53 = vector.broadcast %51 : vector<8x1xf32> to vector<8x8xf32>
    %54 = vector.broadcast %52 : vector<1x8xf32> to vector<8x8xf32>
    %55 = arith.addf %53, %54 : vector<8x8xf32>
    %cst_32 = arith.constant 0.000000e+00 : f32
    %56 = vector.broadcast %cst_32 : f32 to vector<8x8xf32>
    %57 = arith.cmpf ogt, %55, %56 : vector<8x8xf32>
    %cst_33 = arith.constant 2.000000e-01 : f32
    %58 = vector.broadcast %cst_33 : f32 to vector<8x8xf32>
    %59 = arith.mulf %58, %55 : vector<8x8xf32>
    %60 = arith.select %57, %55, %59 : vector<8x8xi1>, vector<8x8xf32>
    %cst_34 = arith.constant -9.99999995E+11 : f32
    %61 = vector.broadcast %cst_34 : f32 to vector<8x8xf32>
    %62 = arith.select %2, %60, %61 : vector<8x8xi1>, vector<8x8xf32>
    %cst_35 = arith.constant dense<0xFF800000> : vector<8xf32>
    %63 = vector.multi_reduction <maximumf>, %62, %cst_35 [1] : vector<8x8xf32> to vector<8xf32>
    %64 = vector.shape_cast %63 : vector<8xf32> to vector<8x1xf32>
    %65 = vector.broadcast %64 : vector<8x1xf32> to vector<8x8xf32>
    %66 = arith.subf %62, %65 : vector<8x8xf32>
    %67 = math.exp %66 : vector<8x8xf32>
    %cst_36 = arith.constant dense<0.000000e+00> : vector<8xf32>
    %68 = vector.multi_reduction <add>, %67, %cst_36 [1] : vector<8x8xf32> to vector<8xf32>
    %69 = vector.shape_cast %68 : vector<8xf32> to vector<8x1xf32>
    %70 = tpu.reciprocal %69 {approx = true} : vector<8x1xf32> -> vector<8x1xf32>
    %71 = vector.broadcast %70 : vector<8x1xf32> to vector<8x8xf32>
    %72 = arith.mulf %67, %71 : vector<8x8xf32>
    %cst_37 = arith.constant dense<0.000000e+00> : vector<8x32xf32>
    %73 = tpu.matmul %72, %50, %cst_37 {dimension_numbers = #tpu.dot_dimension_numbers<[1], [0], [0], [1], [0, 0, 1, 1], [], []>} : vector<8x8xf32>, vector<8x32xf32>, vector<8x32xf32> -> vector<8x32xf32>
    %74 = vector.broadcast %47 : vector<1x32xf32> to vector<8x32xf32>
    %75 = arith.mulf %73, %74 : vector<8x32xf32>
    %76 = vector.broadcast %48 : vector<1x32xf32> to vector<8x32xf32>
    %77 = arith.addf %75, %76 : vector<8x32xf32>
    %cst_38 = arith.constant 0.000000e+00 : f32
    %78 = vector.broadcast %cst_38 : f32 to vector<8x32xf32>
    %79 = arith.cmpf ogt, %77, %78 : vector<8x32xf32>
    %cst_39 = arith.constant 0.000000e+00 : f32
    %80 = vector.broadcast %cst_39 : f32 to vector<8x32xf32>
    %81 = arith.minimumf %77, %80 : vector<8x32xf32>
    %82 = math.exp %81 : vector<8x32xf32>
    %cst_40 = arith.constant 1.000000e+00 : f32
    %83 = vector.broadcast %cst_40 : f32 to vector<8x32xf32>
    %84 = arith.subf %82, %83 : vector<8x32xf32>
    %85 = arith.select %79, %77, %84 : vector<8x32xi1>, vector<8x32xf32>
    %c0_41 = arith.constant 0 : index
    %c0_42 = arith.constant 0 : index
    %86 = vector.load %arg10[%c0_41, %c0_42] : memref<32x129xf32, #tpu.memory_space<vmem>>, vector<32x129xf32>
    %c0_43 = arith.constant 0 : index
    %c0_44 = arith.constant 0 : index
    %87 = vector.load %arg11[%c0_43, %c0_44] : memref<1x32xf32, #tpu.memory_space<vmem>>, vector<1x32xf32>
    %c0_45 = arith.constant 0 : index
    %c0_46 = arith.constant 0 : index
    %88 = vector.load %arg12[%c0_45, %c0_46] : memref<1x128xf32, #tpu.memory_space<vmem>>, vector<1x128xf32>
    %c0_47 = arith.constant 0 : index
    %c0_48 = arith.constant 0 : index
    %89 = vector.load %arg13[%c0_47, %c0_48] : memref<1x128xf32, #tpu.memory_space<vmem>>, vector<1x128xf32>
    %cst_49 = arith.constant dense<0.000000e+00> : vector<8x129xf32>
    %90 = tpu.matmul %85, %86, %cst_49 {dimension_numbers = #tpu.dot_dimension_numbers<[1], [0], [0], [1], [0, 0, 1, 1], [], []>} : vector<8x32xf32>, vector<32x129xf32>, vector<8x129xf32> -> vector<8x129xf32>
    %91 = vector.extract_strided_slice %90 {offsets = [0, 0], sizes = [8, 128], strides = [1, 1]} : vector<8x129xf32> to vector<8x128xf32>
    %92 = vector.extract_strided_slice %90 {offsets = [0, 128], sizes = [8, 1], strides = [1, 1]} : vector<8x129xf32> to vector<8x1xf32>
    %cst_50 = arith.constant dense<0.000000e+00> : vector<1x8xf32>
    %93 = tpu.matmul %87, %85, %cst_50 {dimension_numbers = #tpu.dot_dimension_numbers<[1], [1], [0], [0], [0, 0, 1, 0], [], []>} : vector<1x32xf32>, vector<8x32xf32>, vector<1x8xf32> -> vector<1x8xf32>
    %94 = vector.broadcast %92 : vector<8x1xf32> to vector<8x8xf32>
    %95 = vector.broadcast %93 : vector<1x8xf32> to vector<8x8xf32>
    %96 = arith.addf %94, %95 : vector<8x8xf32>
    %cst_51 = arith.constant 0.000000e+00 : f32
    %97 = vector.broadcast %cst_51 : f32 to vector<8x8xf32>
    %98 = arith.cmpf ogt, %96, %97 : vector<8x8xf32>
    %cst_52 = arith.constant 2.000000e-01 : f32
    %99 = vector.broadcast %cst_52 : f32 to vector<8x8xf32>
    %100 = arith.mulf %99, %96 : vector<8x8xf32>
    %101 = arith.select %98, %96, %100 : vector<8x8xi1>, vector<8x8xf32>
    %cst_53 = arith.constant -9.99999995E+11 : f32
    %102 = vector.broadcast %cst_53 : f32 to vector<8x8xf32>
    %103 = arith.select %2, %101, %102 : vector<8x8xi1>, vector<8x8xf32>
    %cst_54 = arith.constant dense<0xFF800000> : vector<8xf32>
    %104 = vector.multi_reduction <maximumf>, %103, %cst_54 [1] : vector<8x8xf32> to vector<8xf32>
    %105 = vector.shape_cast %104 : vector<8xf32> to vector<8x1xf32>
    %106 = vector.broadcast %105 : vector<8x1xf32> to vector<8x8xf32>
    %107 = arith.subf %103, %106 : vector<8x8xf32>
    %108 = math.exp %107 : vector<8x8xf32>
    %cst_55 = arith.constant dense<0.000000e+00> : vector<8xf32>
    %109 = vector.multi_reduction <add>, %108, %cst_55 [1] : vector<8x8xf32> to vector<8xf32>
    %110 = vector.shape_cast %109 : vector<8xf32> to vector<8x1xf32>
    %111 = tpu.reciprocal %110 {approx = true} : vector<8x1xf32> -> vector<8x1xf32>
    %112 = vector.broadcast %111 : vector<8x1xf32> to vector<8x8xf32>
    %113 = arith.mulf %108, %112 : vector<8x8xf32>
    %cst_56 = arith.constant dense<0.000000e+00> : vector<8x128xf32>
    %114 = tpu.matmul %113, %91, %cst_56 {dimension_numbers = #tpu.dot_dimension_numbers<[1], [0], [0], [1], [0, 0, 1, 1], [], []>} : vector<8x8xf32>, vector<8x128xf32>, vector<8x128xf32> -> vector<8x128xf32>
    %115 = vector.broadcast %88 : vector<1x128xf32> to vector<8x128xf32>
    %116 = arith.mulf %114, %115 : vector<8x128xf32>
    %117 = vector.broadcast %89 : vector<1x128xf32> to vector<8x128xf32>
    %118 = arith.addf %116, %117 : vector<8x128xf32>
    %cst_57 = arith.constant 0.000000e+00 : f32
    %119 = vector.broadcast %cst_57 : f32 to vector<8x128xf32>
    %120 = arith.cmpf ogt, %118, %119 : vector<8x128xf32>
    %cst_58 = arith.constant 0.000000e+00 : f32
    %121 = vector.broadcast %cst_58 : f32 to vector<8x128xf32>
    %122 = arith.minimumf %118, %121 : vector<8x128xf32>
    %123 = math.exp %122 : vector<8x128xf32>
    %cst_59 = arith.constant 1.000000e+00 : f32
    %124 = vector.broadcast %cst_59 : f32 to vector<8x128xf32>
    %125 = arith.subf %123, %124 : vector<8x128xf32>
    %126 = arith.select %120, %118, %125 : vector<8x128xi1>, vector<8x128xf32>
    %c0_60 = arith.constant 0 : index
    %c0_61 = arith.constant 0 : index
    %127 = vector.load %arg14[%c0_60, %c0_61] : memref<8x128xf32, #tpu.memory_space<vmem>>, vector<8x128xf32>
    tpu.vector_store %arg14[%c0_60, %c0_61], %126 {strides = array<i32>} : memref<8x128xf32, #tpu.memory_space<vmem>>, vector<8x128xf32>,
    return
  }
}

</mosaic_0001>

<bundles_post_ra>
// kernel: gat_forward.1
= control target key start
LH: loop header
LB: loop body
LE: loop exit
PB: predicated region body
PF: predicated region fallthrough
CT: control target
= control target key end

     0   :  { %v1022_v1 = vmov 0.0   ;;  %vm1023_vm0 = vmmov 0   ;;  %s1238_s0 = inlined_call_operand.vmem [shape: f32[8,8], index: 0, kind: input, shape index: {}]   ;;  %s1239_s1 = inlined_call_operand.vmem [shape: f32[8,16], index: 1, kind: input, shape index: {}]   ;;  %s1240_s2 = inlined_call_operand.vmem [shape: f32[16,33], index: 2, kind: input, shape index: {}]   ;;  %s1241_s3 = inlined_call_operand.vmem [shape: f32[1,16], index: 3, kind: input, shape index: {}]   ;;  %s1242_s4 = inlined_call_operand.vmem [shape: f32[1,32], index: 4, kind: input, shape index: {}]   ;;  %s1243_s5 = inlined_call_operand.vmem [shape: f32[1,32], index: 5, kind: input, shape index: {}]   ;;  %s1244_s6 = inlined_call_operand.vmem [shape: f32[32,33], index: 6, kind: input, shape index: {}]   ;;  %s1245_s7 = inlined_call_operand.vmem [shape: f32[1,32], index: 7, kind: input, shape index: {}]   ;;  %s1246_s8 = inlined_call_operand.vmem [shape: f32[1,32], index: 8, kind: input, shape index: {}]   ;;  %s1247_s9 = inlined_call_operand.vmem [shape: f32[1,32], index: 9, kind: input, shape index: {}]   ;;  %s1248_s10 = inlined_call_operand.vmem [shape: f32[32,129], index: 10, kind: input, shape index: {}]   ;;  %s1249_s11 = inlined_call_operand.vmem [shape: f32[1,32], index: 11, kind: input, shape index: {}]   ;;  %s1250_s12 = inlined_call_operand.vmem [shape: f32[1,128], index: 12, kind: input, shape index: {}]   ;;  %s1251_s13 = inlined_call_operand.vmem [shape: f32[1,128], index: 13, kind: input, shape index: {}]   ;;  %s1252_s14 = inlined_call_operand.hbm [shape: f32[8,128], index: 14, kind: output, shape index: {}]  }
   0x1   :  { %v52_v0 = vld [vmem:[%s1240_s2 + $0x8] sm:$0xff]  ;;  %926 = vmatprep.subr.mxu0 %v1022_v1  ;;  %v51_v2 = vld [vmem:[%s1240_s2] sm:$0xff]  ;;  %930 = vmatprep.mubr.msk.f32.mxu0 %vm1023_vm0, %v1022_v1 }
   0x2   :  { %19 = vsyncpa [#allocation3], 0  ;;  %927 = vmatpush3.msra.mxu0 %v52_v0  ;;  %v50_v3 = vld [vmem:[%s1239_s1] sm:$0xff]  ;;  %vm56_vm1 = vcmask 130048   ;;  %933 = vmatprep.subr.mxu1 %v1022_v1  ;;  %v1024_v5 = vmov 32   ;;  %v208_v10 = vlaneseq  ;;  %vm217_vm4 = vcmask 64512  }
   0x3   :  { %928 = vmatprep.subr.mxu0 %v1022_v1  ;;  %934 = vmatpush3.xpose.msk.msra.mxu1 %vm56_vm1, %v50_v3  ;;  %v53_v4 = vld [vmem:[%s1241_s3] sm:$0x1]  ;;  %v325_v29 = vld [vmem:[%s1244_s6 + $0x18] sm:$0xff]  ;;  %v324_v30 = vld [vmem:[%s1244_s6 + $0x10] sm:$0xff]  ;;  %vm329_vm5 = vcmask 261120  }
   0x4   :  { %929 = vmatpush3.msra.mxu0 %v51_v2  ;;  %935 = vmatprep.mubr.msk.f32.mxu1 %vm1023_vm0, %v1022_v1  ;;  %v209_v11 = vshrl.u32 %v208_v10, 7  ;;  %v1134_v15 = vld [vmem:[%s1238_s0] sm:$0xff]  ;;  %v323_v31 = vld [vmem:[%s1244_s6 + $0x8] sm:$0xff]  ;;  %v601_v0 = vld [vmem:[%s1248_s10 + $0x38] sm:$0xff] }
   0x5   :  { %931 = vmatmul.mubr.msk.f32.vlgmr.msra.gmra.mxu0 %vm56_vm1, %v50_v3  ;;  %979 = vset.pattern.permute.xlu0 %v1024_v5  ;;  %vm49_vm2 = vcmp.gt.f32.partialorder %v1134_v15, 0.0  ;;  %v322_v32 = vld [vmem:[%s1244_s6] sm:$0xff]  ;;  %v600_v2 = vld [vmem:[%s1248_s10 + $0x30] sm:$0xff]  ;;  %v599_v3 = vld [vmem:[%s1248_s10 + $0x28] sm:$0xff] }
   0x6   :  { %936 = vmatmul.mubr.msk.f32.vlgmr.msra.gmra.mxu1 %vm56_vm1, %v53_v4  ;;  %938 = vmatprep.subr.mxu0 %v1022_v1  ;;  %v1128_v12 = vsub.s32 0, %v209_v11  ;;  %v889_v33 = vld [vmem:[%s1242_s4] ss:$0 sm:$0xff]  ;;  %s1026_s4 = smov [#allocation2]  }
   0x7   :  { %940 = vmatprep.mubr.msk.f32.mxu0 %vm1023_vm0, %v1022_v1  ;;  %943 = vmatprep.subr.mxu1 %v1022_v1  ;;  %v890_v34 = vld [vmem:[%s1243_s5] ss:$0 sm:$0xff]  ;;  %s877_s6 = sshll.u32 %s1026_s4, 4  ;;  %s878_s6 = int_to_ptr.vmem [resolvable:$true] %s877_s6 }
   0x8   :  { %951 = vmatprep.mubr.msk.f32.mxu1 %vm1023_vm0, %v1022_v1  ;;  %980 = vset.pattern.permute.xlu1 %v1024_v5  ;;  %v326_v44 = vld [vmem:[%s1245_s7] sm:$0x1]  ;;  %v597_v5 = vld [vmem:[%s1248_s10 + $0x18] sm:$0xff]  ;;  %p1005_p1 = scmp.lt.s32.totalorder %s878_s6, %s878_s6 }
   0x9   :  { %944 = vmatpush3.msra.mxu1 %v325_v29  ;;  %v598_v4 = vld [vmem:[%s1248_s10 + $0x20] sm:$0xff] }
   0xa   :  { %945 = vmatprep.subr.mxu1 %v1022_v1  ;;  %v897_v10 = vld [vmem:[%s1247_s9] ss:$0 sm:$0xff] }
   0xb   :  { %946 = vmatpush3.msra.mxu1 %v324_v30  ;;  %v903_v15 = vld [vmem:[%s1250_s12] ss:$0 sm:$0xff]  ;;  %s1000_s12 = scalar_lea.vmem %s878_s6, 128 }
   0xc   :  { %947 = vmatprep.subr.mxu1 %v1022_v1  ;;  %p1001_p0 = scmp.ne.s32.totalorder %s878_s6, %s1000_s12  ;;  %p1006_p2 = scmp.lt.s32.totalorder %s1000_s12, %s1000_s12 }
   0xd   :  { %948 = vmatpush3.msra.mxu1 %v323_v31 }
   0xe   :  { %949 = vmatprep.subr.mxu1 %v1022_v1  ;;  %p1007_p3 = por %p1006_p2, %p1005_p1 }
   0xf   :  { %950 = vmatpush3.msra.mxu1 %v322_v32 }
  0x10   :  { %632 = vmatprep.subr.mxu1 %v601_v0  ;;  %p1008_p4 = pnand %p1007_p3, %p1001_p0 }
  0xc5   :  { %v126_v6 = vpop.f32.mrf.mxu0 }
  0xc6   :  { %205 = vperm.xlu0 %979, %v126_v6   ;;  %939 = vmatpush3.msra.mxu0 %v126_v6  ;;  %v199_v7 = vpop.f32.mrf.mxu1  ;;  %v596_v6 = vld [vmem:[%s1248_s10 + $0x10] sm:$0xff] }
  0xc7   :  { %v932_v8 = vpop.f32.mrf.mxu0  ;;  %954 = vmatprep.subr.mxu0 %v1022_v1  ;;  %v211_v13 = vrot.slane %v199_v7, %v1128_v12  ;;  %v595_v7 = vld [vmem:[%s1248_s10 + $0x8] sm:$0xff] }
  0xc8   :  { %v937_v9 = vpop.f32.mrf.mxu1  ;;  %v594_v8 = vld [vmem:[%s1248_s10] sm:$0xff] }
  0xc9   :  { %v896_v9 = vld [vmem:[%s1246_s8] ss:$0 sm:$0xff] }
 0x141   :  { %v206_v14 = vpop.permute.xlu0 %205 }
 0x142   :  { %v212_v16 = vadd.f32 %v211_v13, %v206_v14 }
 0x144   :  { %v214_v17 = vmul.f32 0.2, %v212_v16  ;;  %vm213_vm3 = vcmp.gt.f32.partialorder %v212_v16, 0.0 }
 0x146   :  { %v215_v18 = vsel %vm213_vm3, %v212_v16, %v214_v17 }
 0x147   :  { %v216_v19 = vsel %vm49_vm2, %v215_v18, -1e+12 }
 0x148   :  { %v218_v20 = vsel %vm217_vm4, %v216_v19, -inf }
 0x149   :  { %219 = vmax.xlane.f32.xlu0 %v218_v20 }
 0x1d2   :  { %v220_v21 = vpop.xlane.xlu0 %219 }
 0x1d3   :  { %v221_v22 = vsub.f32 %v216_v19, %v220_v21 }
 0x1d5   :  { %v222_v23 = vmul.f32 1.442695, %v221_v22  ;;  %v602_v22 = vld [vmem:[%s1249_s11] sm:$0x1] }
 0x1d7   :  { %982 = vpow2.f32 %v222_v23  ;;  %v1025_v23 = vmov 0  }
 0x1d8   :  { %981 = vset.pattern.permute.xlu0 %v1025_v23 }
 0x1e4   :  { %v983_v24 = vpop.eup %982 }
 0x1e5   :  { %v224_v25 = vsel %vm217_vm4, %v983_v24, 0.0 }
 0x1e6   :  { %225 = vadd.xlane.f32.xlu1 %v224_v25 }
 0x26f   :  { %v226_v26 = vpop.xlane.xlu1 %225 }
 0x270   :  { %984 = vrcp.f32 %v226_v26 }
 0x27d   :  { %v985_v27 = vpop.eup %984 }
 0x27e   :  { %v228_v28 = vmul.f32 %v985_v27, %v983_v24 }
 0x280   :  { %941 = vmatmul.mubr.msk.f32.vlgmr.msra.gmra.mxu0 %vm217_vm4, %v228_v28 }
 0x281   :  { %956 = vmatprep.mubr.msk.f32.mxu0 %vm1023_vm0, %v1022_v1 }
 0x340   :  { %v298_v35 = vpop.f32.mrf.mxu0 }
 0x341   :  { %v308_v36 = vmul.f32 %v889_v33, %v298_v35 }
 0x342   :  { %v942_v37 = vpop.f32.mrf.mxu0 }
 0x343   :  { %v315_v38 = vadd.f32 %v890_v34, %v308_v36 }
 0x345   :  { %v317_v39 = vmin.f32 %v315_v38, 0.0  ;;  %vm316_vm6 = vcmp.gt.f32.partialorder %v315_v38, 0.0 }
 0x347   :  { %v318_v40 = vmul.f32 1.442695, %v317_v39 }
 0x349   :  { %986 = vpow2.f32 %v318_v40 }
 0x356   :  { %v987_v41 = vpop.eup %986 }
 0x357   :  { %v891_v42 = vadd.f32 -1.0, %v987_v41  ;;  %v904_v41 = vld [vmem:[%s1251_s13] ss:$0 sm:$0xff] }
 0x359   :  { %v321_v43 = vsel %vm316_vm6, %v315_v38, %v891_v42 }
 0x35a   :  { %952 = vmatmul.mubr.msk.f32.vlgmr.msra.gmra.mxu1 %vm329_vm5, %v321_v43  ;;  %955 = vmatpush3.xpose.msk.msra.mxu0 %vm329_vm5, %v321_v43 }
 0x35b   :  { %959 = vmatprep.subr.mxu0 %v1022_v1  ;;  %672 = vmatprep.mubr.f32.mxu1 %v1022_v1 }
 0x35c   :  { %633 = vmatpush1.msra.mxu1 %v600_v2 }
 0x35d   :  { %957 = vmatmul.mubr.msk.f32.vlgmr.msra.gmra.mxu0 %vm329_vm5, %v326_v44  ;;  %634 = vmatprep.subr.mxu1 %v599_v3 }
 0x35e   :  { %961 = vmatprep.mubr.msk.f32.mxu0 %vm1023_vm0, %v1022_v1  ;;  %635 = vmatpush1.msra.mxu1 %v598_v4 }
 0x35f   :  { %636 = vmatprep.subr.mxu1 %v597_v5 }
 0x360   :  { %637 = vmatpush1.msra.mxu1 %v596_v6 }
 0x361   :  { %638 = vmatprep.subr.mxu1 %v595_v7 }
 0x362   :  { %639 = vmatpush1.msra.mxu1 %v594_v8 }
 0x41a   :  { %v399_v45 = vpop.f32.mrf.mxu1 }
 0x41b   :  { %478 = vperm.xlu1 %980, %v399_v45   ;;  %960 = vmatpush3.msra.mxu0 %v399_v45 }
 0x41c   :  { %v953_v46 = vpop.f32.mrf.mxu1  ;;  %964 = vmatprep.subr.mxu0 %v1022_v1 }
 0x41d   :  { %v472_v47 = vpop.f32.mrf.mxu0 }
 0x41e   :  { %v484_v49 = vrot.slane %v472_v47, %v1128_v12 }
 0x41f   :  { %v958_v48 = vpop.f32.mrf.mxu0 }
 0x496   :  { %v479_v50 = vpop.permute.xlu1 %478 }
 0x497   :  { %v485_v51 = vadd.f32 %v484_v49, %v479_v50 }
 0x499   :  { %v487_v52 = vmul.f32 0.2, %v485_v51  ;;  %vm486_vm7 = vcmp.gt.f32.partialorder %v485_v51, 0.0 }
 0x49b   :  { %v488_v53 = vsel %vm486_vm7, %v485_v51, %v487_v52 }
 0x49c   :  { %v489_v54 = vsel %vm49_vm2, %v488_v53, -1e+12 }
 0x49d   :  { %v490_v55 = vsel %vm217_vm4, %v489_v54, -inf }
 0x49e   :  { %491 = vmax.xlane.f32.xlu1 %v490_v55 }
 0x527   :  { %v492_v56 = vpop.xlane.xlu1 %491 }
 0x528   :  { %v493_v57 = vsub.f32 %v489_v54, %v492_v56 }
 0x52a   :  { %v494_v58 = vmul.f32 1.442695, %v493_v57 }
 0x52c   :  { %988 = vpow2.f32 %v494_v58 }
 0x539   :  { %v989_v59 = vpop.eup %988 }
 0x53a   :  { %v496_v60 = vsel %vm217_vm4, %v989_v59, 0.0 }
 0x53b   :  { %497 = vadd.xlane.f32.xlu0 %v496_v60 }
 0x5c4   :  { %v498_v61 = vpop.xlane.xlu0 %497 }
 0x5c5   :  { %990 = vrcp.f32 %v498_v61 }
 0x5d2   :  { %v991_v62 = vpop.eup %990 }
 0x5d3   :  { %v500_v63 = vmul.f32 %v991_v62, %v989_v59 }
 0x5d5   :  { %962 = vmatmul.mubr.msk.f32.vlgmr.msra.gmra.mxu0 %vm217_vm4, %v500_v63 }
 0x5d6   :  { %966 = vmatprep.mubr.msk.f32.mxu0 %vm1023_vm0, %v1022_v1 }
 0x695   :  { %v570_v11 = vpop.f32.mrf.mxu0 }
 0x696   :  { %v580_v13 = vmul.f32 %v896_v9, %v570_v11 }
 0x697   :  { %v963_v14 = vpop.f32.mrf.mxu0 }
 0x698   :  { %v587_v16 = vadd.f32 %v897_v10, %v580_v13 }
 0x69a   :  { %v589_v17 = vmin.f32 %v587_v16, 0.0  ;;  %vm588_vm8 = vcmp.gt.f32.partialorder %v587_v16, 0.0 }
 0x69c   :  { %v590_v18 = vmul.f32 1.442695, %v589_v17 }
 0x69e   :  { %992 = vpow2.f32 %v590_v18 }
 0x6ab   :  { %v993_v19 = vpop.eup %992 }
 0x6ac   :  { %v898_v20 = vadd.f32 -1.0, %v993_v19 }
 0x6ae   :  { %v593_v21 = vsel %vm588_vm8, %v587_v16, %v898_v20 }
 0x6af   :  { %899 = vmatmul.mubr.msk.f32.vlgmr.msra.gmra.mxu1 %vm329_vm5, %v593_v21  ;;  %965 = vmatpush3.xpose.msk.msra.mxu0 %vm329_vm5, %v593_v21 }
 0x6b0   :  { %969 = vmatprep.subr.mxu0 %v1022_v1 }
 0x6b2   :  { %967 = vmatmul.mubr.msk.f32.vlgmr.msra.gmra.mxu0 %vm329_vm5, %v602_v22 }
 0x6b3   :  { %971 = vmatprep.mubr.msk.f32.mxu0 %vm1023_vm0, %v1022_v1 }
 0x76f   :  { %v674_v24 = vpop.f32.mrf.mxu1 }
 0x770   :  { %970 = vmatpush3.msra.mxu0 %v674_v24 }
 0x771   :  { %v676_v25 = vpop.f32.mrf.mxu1 }
 0x772   :  { %754 = vperm.xlu0 %981, %v676_v25   ;;  %v748_v26 = vpop.f32.mrf.mxu0 }
 0x773   :  { %v760_v28 = vrot.slane %v748_v26, %v1128_v12 }
 0x774   :  { %v968_v27 = vpop.f32.mrf.mxu0 }
 0x7ed   :  { %v755_v29 = vpop.permute.xlu0 %754 }
 0x7ee   :  { %v761_v30 = vadd.f32 %v760_v28, %v755_v29 }
 0x7f0   :  { %v763_v31 = vmul.f32 0.2, %v761_v30  ;;  %vm762_vm9 = vcmp.gt.f32.partialorder %v761_v30, 0.0 }
 0x7f2   :  { %v764_v32 = vsel %vm762_vm9, %v761_v30, %v763_v31 }
 0x7f3   :  { %v765_v33 = vsel %vm49_vm2, %v764_v32, -1e+12 }
 0x7f4   :  { %v766_v1 = vsel %vm217_vm4, %v765_v33, -inf }
 0x7f5   :  { %767 = vmax.xlane.f32.xlu1 %v766_v1 }
 0x87e   :  { %v768_v34 = vpop.xlane.xlu1 %767 }
 0x87f   :  { %v769_v35 = vsub.f32 %v765_v33, %v768_v34 }
 0x881   :  { %v770_v36 = vmul.f32 1.442695, %v769_v35 }
 0x883   :  { %994 = vpow2.f32 %v770_v36 }
 0x890   :  { %v995_v37 = vpop.eup %994 }
 0x891   :  { %v772_v38 = vsel %vm217_vm4, %v995_v37, 0.0 }
 0x892   :  { %773 = vadd.xlane.f32.xlu1 %v772_v38 }
 0x91b   :  { %v774_v12 = vpop.xlane.xlu1 %773 }
 0x91c   :  { %996 = vrcp.f32 %v774_v12 }
 0x929   :  { %v997_v39 = vpop.eup %996 }
 0x92a   :  { %v776_v40 = vmul.f32 %v997_v39, %v995_v37 }
 0x92c   :  { %972 = vmatmul.mubr.msk.f32.vlgmr.msra.gmra.mxu0 %vm217_vm4, %v776_v40 }
 0x9ec   :  { %v846_v42 = vpop.f32.mrf.mxu0 }
 0x9ed   :  { %v856_v43 = vmul.f32 %v903_v15, %v846_v42 }
 0x9ee   :  { %v973_v44 = vpop.f32.mrf.mxu0 }
 0x9ef   :  { %v863_v45 = vadd.f32 %v904_v41, %v856_v43 }
 0x9f1   :  { %v865_v46 = vmin.f32 %v863_v45, 0.0  ;;  %vm864_vm10 = vcmp.gt.f32.partialorder %v863_v45, 0.0 }
 0x9f3   :  { %v866_v47 = vmul.f32 1.442695, %v865_v46 }
 0x9f5   :  { %998 = vpow2.f32 %v866_v47 }
 0xa02   :  { %v999_v48 = vpop.eup %998 }
 0xa03   :  { %v905_v49 = vadd.f32 -1.0, %v999_v48 }
 0xa05   :  { %v869_v50 = vsel %vm864_vm10, %v863_v45, %v905_v49 }
 0xa06   :  { %870 = vst [vmem:[#allocation2] sm:$0xff] %v869_v50 }
 0xa07   :  { %1011 = shalt.err (!%p1008_p4)
}
 0xa08   :  { %880 = dma.vmem_to_hbm [thread:$0]  %s878_s6, 128, %s1252_s14, [#allocation3]  }
 0xa09   :  { %1020 = dma.done.wait [#allocation3], 128  }
 0xa0a   :  { %1021 = vsyncadd [#allocation3], 4294967168 }
 0xa0b   :  { %884 = vsyncpa [#allocation3], 1 }

</bundles_post_ra>
